<compile_context>
chip_gen: v7x
topology: tpu7x:2x2x1
jax: 0.10.0
libtpu: 0.0.40
codegen_flags: <defaults>
</compile_context>

<pallas_src>
import math
import functools

import numpy as np
import jax
import jax.numpy as jnp
from jax import lax
from jax.experimental import pallas as pl
from jax.experimental.pallas import tpu as pltpu

PAD = 0


def _round_up(x, m):
    return ((x + m - 1) // m) * m


def _embeddings_kernel(ids_smem, w_hbm, sig_ref, out_ref, gbuf, sem, *, scale, tl):
    # ids_smem : (B, Lp) int32 in SMEM (scalar prefetch)
    # w_hbm    : (V, D)  f32 ref left in HBM (memory_space=pl.ANY)
    # sig_ref  : (TL, D) f32 positional-signal tile for this sequence tile
    # out_ref  : (TL, D) f32 output tile (batch dim squeezed away)
    # gbuf     : (TL, D) f32 VMEM scratch holding the gathered embedding rows
    # sem      : single DMA semaphore shared by all TL row copies
    lt = pl.program_id(0)     # sequence-tile index
    b = pl.program_id(1)      # batch index
    base = lt * tl

    # Issue TL fire-and-forget row-gather DMAs (all in flight simultaneously).
    def issue(i, carry):
        row = ids_smem[b, base + i]
        pltpu.make_async_copy(w_hbm.at[row], gbuf.at[i], sem).start()
        return carry

    lax.fori_loop(0, tl, issue, 0, unroll=8)

    # Wait for all TL row copies: DMA semaphores count bytes, so a descriptor
    # covering the whole (TL, D) buffer equals the sum of the TL row copies.
    pltpu.make_async_copy(gbuf, gbuf, sem).wait()

    emb = gbuf[...].astype(jnp.float32) * scale + sig_ref[...]
    out_ref[...] = emb.astype(out_ref.dtype)


def _position_signal(length, channels, min_timescale=1.0, max_timescale=10000.0):
    # Mirrors Embeddings._add_pos_embedding (constant table -> plain JAX glue).
    assert channels % 2 == 0
    num_timescales = channels // 2
    log_timescale_increment = math.log(float(max_timescale) / float(min_timescale)) / (
        float(num_timescales) - 1.0
    )
    position = jnp.arange(length, dtype=jnp.float32)
    inv_timescales = min_timescale * jnp.exp(
        jnp.arange(num_timescales, dtype=jnp.float32) * -log_timescale_increment
    )
    scaled_time = position[:, None] * inv_timescales[None, :]                     # (L, D/2)
    return jnp.concatenate([jnp.sin(scaled_time), jnp.cos(scaled_time)], axis=1)  # (L, D)


def embeddings_forward(x_ids, weight, *, tokens_per_tile=256):
    """x_ids: int32 [B, L]; weight: float32 [V, D] -> float32 [B, L, D]."""
    B, L = x_ids.shape
    V, D = weight.shape
    scale = float(D) ** 0.5

    # Tile size: multiple of 8 (f32 sublane count), capped by the (rounded) seq len.
    TL = min(_round_up(int(tokens_per_tile), 8), _round_up(L, 8))
    Lp = _round_up(L, TL)
    n_tiles = Lp // TL

    # Clamp ids (jnp.take semantics; also guards the data-dependent row DMAs),
    # pad the sequence to a multiple of TL (padding tokens gather row 0).
    ids = jnp.clip(x_ids.astype(jnp.int32), 0, V - 1)
    if Lp != L:
        ids = jnp.pad(ids, ((0, 0), (0, Lp - L)))

    # Constant sinusoid table for the padded length (plain JAX glue).
    signal = _position_signal(Lp, D).astype(jnp.float32)                          # (Lp, D)

    kernel = functools.partial(_embeddings_kernel, scale=scale, tl=TL)

    grid_spec = pltpu.PrefetchScalarGridSpec(
        num_scalar_prefetch=1,            # `ids` lands in SMEM, feeds the kernel + index_maps
        grid=(n_tiles, B),                # batch innermost -> signal block index constant over b
        in_specs=[
            # Weight table stays in HBM; rows are gathered with manual DMAs.
            pl.BlockSpec(memory_space=pl.ANY),
            # Positional-signal tile for this sequence tile (re-fetched only when lt changes).
            pl.BlockSpec((TL, D), lambda lt, b, ids: (lt, 0)),
        ],
        # Squeeze the batch dim; write a sublane/lane-dense (TL, D) tile per step.
        out_specs=pl.BlockSpec((pl.Squeezed(), TL, D), lambda lt, b, ids: (b, lt, 0)),
        scratch_shapes=[
            pltpu.VMEM((TL, D), weight.dtype),    # gathered-rows buffer
            pltpu.SemaphoreType.DMA(()),          # one semaphore for all row copies
        ],
    )

    # Memory-bound gather: B*L rows read + B*L rows written + signal once + ids.
    itemsize = int(weight.dtype.itemsize)
    bytes_accessed = int(2 * B * Lp * D * itemsize + Lp * D * 4 + B * Lp * 4)
    cost = pl.CostEstimate(flops=int(2 * B * Lp * D), transcendentals=0,
                           bytes_accessed=bytes_accessed)

    out = pl.pallas_call(
        kernel,
        out_shape=jax.ShapeDtypeStruct((B, Lp, D), weight.dtype),
        grid_spec=grid_spec,
        compiler_params=pltpu.CompilerParams(
            dimension_semantics=("parallel", "parallel")),
        cost_estimate=cost,
    )(ids, weight, signal)

    return out[:, :L, :] if Lp != L else out


if __name__ == "__main__":
    # Small shapes consistent with the module; D a multiple of 128 -> lane-dense rows.
    V, D = 64, 128
    B, L = 2, 8
    scale = float(D) ** 0.5

    key = jax.random.PRNGKey(0)
    k_w, k_x = jax.random.split(key)

    # nn.init.uniform_(-1/scale, 1/scale), then zero the padding row.
    weight = jax.random.uniform(
        k_w, (V, D), dtype=jnp.float32, minval=-1.0 / scale, maxval=1.0 / scale
    )
    weight = weight.at[PAD].set(0.0)

    x_ids = jax.random.randint(k_x, (B, L), 0, V, dtype=jnp.int32)
    # make sure a padding token appears (its embedding must stay all-zero pre-signal)
    x_ids = x_ids.at[0, 0].set(PAD)

    out = embeddings_forward(x_ids, weight)
    out = jax.block_until_ready(out)

    # Pure-JAX reference for correctness.
    ref = jnp.take(weight, x_ids, axis=0) * scale + _position_signal(L, D)[None]
    np.testing.assert_allclose(np.asarray(out), np.asarray(ref), rtol=1e-6, atol=1e-6)

    print("KERNEL_OK")
</pallas_src>

<mosaic_0001>
module attributes {stable_mosaic.version = 11 : i64} {
  func.func @_embeddings_kernel(%arg0: i32, %arg1: i32, %arg2: memref<2x8xi32, #tpu.memory_space<smem>>, %arg3: memref<64x128xf32, #tpu.memory_space<any>>, %arg4: memref<8x128xf32, #tpu.memory_space<vmem>>, %arg5: memref<1x8x128xf32, #tpu.memory_space<vmem>>, %arg6: memref<8x128xf32, #tpu.memory_space<vmem>>, %arg7: memref<!tpu.dma_semaphore, #tpu.memory_space<semaphore_mem>>) attributes {dimension_semantics = [#tpu.dimension_semantics<parallel>, #tpu.dimension_semantics<parallel>], iteration_bounds = array<i64: 1, 2>, scalar_prefetch = 1 : i64, scratch_operands = 2 : i64, tpu.core_type = #tpu.core_type<tc>, window_params = [{}, {transform_indices = @transform_1, window_bounds = array<i64: 8, 128>}, {transform_indices = @transform_2, window_bounds = array<i64: 1, 8, 128>}]} {
    %c8_i32 = arith.constant 8 : i32
    %0 = arith.muli %arg0, %c8_i32 : i32
    %c0_i32 = arith.constant 0 : i32
    %1 = arith.addi %0, %c0_i32 : i32
    %2 = arith.index_cast %arg1 : i32 to index
    %3 = arith.index_cast %1 : i32 to index
    %4 = memref.load %arg2[%2, %3] : memref<2x8xi32, #tpu.memory_space<smem>>
    %c0_i32_0 = arith.constant 0 : i32
    %5 = tpu.memref_slice %arg3[%4, %c0_i32_0] : memref<64x128xf32, #tpu.memory_space<any>> -> memref<1x128xf32, #tpu.memory_space<any>>
    %6 = tpu.memref_squeeze %5 : memref<1x128xf32, #tpu.memory_space<any>> -> memref<128xf32, #tpu.memory_space<any>>
    %c0_i32_1 = arith.constant 0 : i32
    %7 = tpu.memref_slice %arg6[%c0_i32, %c0_i32_1] : memref<8x128xf32, #tpu.memory_space<vmem>> -> memref<1x128xf32, #tpu.memory_space<vmem>>
    %8 = tpu.memref_squeeze %7 : memref<1x128xf32, #tpu.memory_space<vmem>> -> memref<128xf32, #tpu.memory_space<vmem>>
    tpu.enqueue_dma source(%6 : memref<128xf32, #tpu.memory_space<any>>) target(%8 : memref<128xf32, #tpu.memory_space<vmem>>) target_semaphore(%arg7 : memref<!tpu.dma_semaphore, #tpu.memory_space<semaphore_mem>>)
    %c1_i32 = arith.constant 1 : i32
    %9 = arith.addi %0, %c1_i32 : i32
    %10 = arith.index_cast %arg1 : i32 to index
    %11 = arith.index_cast %9 : i32 to index
    %12 = memref.load %arg2[%10, %11] : memref<2x8xi32, #tpu.memory_space<smem>>
    %c0_i32_2 = arith.constant 0 : i32
    %13 = tpu.memref_slice %arg3[%12, %c0_i32_2] : memref<64x128xf32, #tpu.memory_space<any>> -> memref<1x128xf32, #tpu.memory_space<any>>
    %14 = tpu.memref_squeeze %13 : memref<1x128xf32, #tpu.memory_space<any>> -> memref<128xf32, #tpu.memory_space<any>>
    %c0_i32_3 = arith.constant 0 : i32
    %15 = tpu.memref_slice %arg6[%c1_i32, %c0_i32_3] : memref<8x128xf32, #tpu.memory_space<vmem>> -> memref<1x128xf32, #tpu.memory_space<vmem>>
    %16 = tpu.memref_squeeze %15 : memref<1x128xf32, #tpu.memory_space<vmem>> -> memref<128xf32, #tpu.memory_space<vmem>>
    tpu.enqueue_dma source(%14 : memref<128xf32, #tpu.memory_space<any>>) target(%16 : memref<128xf32, #tpu.memory_space<vmem>>) target_semaphore(%arg7 : memref<!tpu.dma_semaphore, #tpu.memory_space<semaphore_mem>>)
    %c2_i32 = arith.constant 2 : i32
    %17 = arith.addi %0, %c2_i32 : i32
    %18 = arith.index_cast %arg1 : i32 to index
    %19 = arith.index_cast %17 : i32 to index
    %20 = memref.load %arg2[%18, %19] : memref<2x8xi32, #tpu.memory_space<smem>>
    %c0_i32_4 = arith.constant 0 : i32
    %21 = tpu.memref_slice %arg3[%20, %c0_i32_4] : memref<64x128xf32, #tpu.memory_space<any>> -> memref<1x128xf32, #tpu.memory_space<any>>
    %22 = tpu.memref_squeeze %21 : memref<1x128xf32, #tpu.memory_space<any>> -> memref<128xf32, #tpu.memory_space<any>>
    %c0_i32_5 = arith.constant 0 : i32
    %23 = tpu.memref_slice %arg6[%c2_i32, %c0_i32_5] : memref<8x128xf32, #tpu.memory_space<vmem>> -> memref<1x128xf32, #tpu.memory_space<vmem>>
    %24 = tpu.memref_squeeze %23 : memref<1x128xf32, #tpu.memory_space<vmem>> -> memref<128xf32, #tpu.memory_space<vmem>>
    tpu.enqueue_dma source(%22 : memref<128xf32, #tpu.memory_space<any>>) target(%24 : memref<128xf32, #tpu.memory_space<vmem>>) target_semaphore(%arg7 : memref<!tpu.dma_semaphore, #tpu.memory_space<semaphore_mem>>)
    %c3_i32 = arith.constant 3 : i32
    %25 = arith.addi %0, %c3_i32 : i32
    %26 = arith.index_cast %arg1 : i32 to index
    %27 = arith.index_cast %25 : i32 to index
    %28 = memref.load %arg2[%26, %27] : memref<2x8xi32, #tpu.memory_space<smem>>
    %c0_i32_6 = arith.constant 0 : i32
    %29 = tpu.memref_slice %arg3[%28, %c0_i32_6] : memref<64x128xf32, #tpu.memory_space<any>> -> memref<1x128xf32, #tpu.memory_space<any>>
    %30 = tpu.memref_squeeze %29 : memref<1x128xf32, #tpu.memory_space<any>> -> memref<128xf32, #tpu.memory_space<any>>
    %c0_i32_7 = arith.constant 0 : i32
    %31 = tpu.memref_slice %arg6[%c3_i32, %c0_i32_7] : memref<8x128xf32, #tpu.memory_space<vmem>> -> memref<1x128xf32, #tpu.memory_space<vmem>>
    %32 = tpu.memref_squeeze %31 : memref<1x128xf32, #tpu.memory_space<vmem>> -> memref<128xf32, #tpu.memory_space<vmem>>
    tpu.enqueue_dma source(%30 : memref<128xf32, #tpu.memory_space<any>>) target(%32 : memref<128xf32, #tpu.memory_space<vmem>>) target_semaphore(%arg7 : memref<!tpu.dma_semaphore, #tpu.memory_space<semaphore_mem>>)
    %c4_i32 = arith.constant 4 : i32
    %33 = arith.addi %0, %c4_i32 : i32
    %34 = arith.index_cast %arg1 : i32 to index
    %35 = arith.index_cast %33 : i32 to index
    %36 = memref.load %arg2[%34, %35] : memref<2x8xi32, #tpu.memory_space<smem>>
    %c0_i32_8 = arith.constant 0 : i32
    %37 = tpu.memref_slice %arg3[%36, %c0_i32_8] : memref<64x128xf32, #tpu.memory_space<any>> -> memref<1x128xf32, #tpu.memory_space<any>>
    %38 = tpu.memref_squeeze %37 : memref<1x128xf32, #tpu.memory_space<any>> -> memref<128xf32, #tpu.memory_space<any>>
    %c0_i32_9 = arith.constant 0 : i32
    %39 = tpu.memref_slice %arg6[%c4_i32, %c0_i32_9] : memref<8x128xf32, #tpu.memory_space<vmem>> -> memref<1x128xf32, #tpu.memory_space<vmem>>
    %40 = tpu.memref_squeeze %39 : memref<1x128xf32, #tpu.memory_space<vmem>> -> memref<128xf32, #tpu.memory_space<vmem>>
    tpu.enqueue_dma source(%38 : memref<128xf32, #tpu.memory_space<any>>) target(%40 : memref<128xf32, #tpu.memory_space<vmem>>) target_semaphore(%arg7 : memref<!tpu.dma_semaphore, #tpu.memory_space<semaphore_mem>>)
    %c5_i32 = arith.constant 5 : i32
    %41 = arith.addi %0, %c5_i32 : i32
    %42 = arith.index_cast %arg1 : i32 to index
    %43 = arith.index_cast %41 : i32 to index
    %44 = memref.load %arg2[%42, %43] : memref<2x8xi32, #tpu.memory_space<smem>>
    %c0_i32_10 = arith.constant 0 : i32
    %45 = tpu.memref_slice %arg3[%44, %c0_i32_10] : memref<64x128xf32, #tpu.memory_space<any>> -> memref<1x128xf32, #tpu.memory_space<any>>
    %46 = tpu.memref_squeeze %45 : memref<1x128xf32, #tpu.memory_space<any>> -> memref<128xf32, #tpu.memory_space<any>>
    %c0_i32_11 = arith.constant 0 : i32
    %47 = tpu.memref_slice %arg6[%c5_i32, %c0_i32_11] : memref<8x128xf32, #tpu.memory_space<vmem>> -> memref<1x128xf32, #tpu.memory_space<vmem>>
    %48 = tpu.memref_squeeze %47 : memref<1x128xf32, #tpu.memory_space<vmem>> -> memref<128xf32, #tpu.memory_space<vmem>>
    tpu.enqueue_dma source(%46 : memref<128xf32, #tpu.memory_space<any>>) target(%48 : memref<128xf32, #tpu.memory_space<vmem>>) target_semaphore(%arg7 : memref<!tpu.dma_semaphore, #tpu.memory_space<semaphore_mem>>)
    %c6_i32 = arith.constant 6 : i32
    %49 = arith.addi %0, %c6_i32 : i32
    %50 = arith.index_cast %arg1 : i32 to index
    %51 = arith.index_cast %49 : i32 to index
    %52 = memref.load %arg2[%50, %51] : memref<2x8xi32, #tpu.memory_space<smem>>
    %c0_i32_12 = arith.constant 0 : i32
    %53 = tpu.memref_slice %arg3[%52, %c0_i32_12] : memref<64x128xf32, #tpu.memory_space<any>> -> memref<1x128xf32, #tpu.memory_space<any>>
    %54 = tpu.memref_squeeze %53 : memref<1x128xf32, #tpu.memory_space<any>> -> memref<128xf32, #tpu.memory_space<any>>
    %c0_i32_13 = arith.constant 0 : i32
    %55 = tpu.memref_slice %arg6[%c6_i32, %c0_i32_13] : memref<8x128xf32, #tpu.memory_space<vmem>> -> memref<1x128xf32, #tpu.memory_space<vmem>>
    %56 = tpu.memref_squeeze %55 : memref<1x128xf32, #tpu.memory_space<vmem>> -> memref<128xf32, #tpu.memory_space<vmem>>
    tpu.enqueue_dma source(%54 : memref<128xf32, #tpu.memory_space<any>>) target(%56 : memref<128xf32, #tpu.memory_space<vmem>>) target_semaphore(%arg7 : memref<!tpu.dma_semaphore, #tpu.memory_space<semaphore_mem>>)
    %c7_i32 = arith.constant 7 : i32
    %57 = arith.addi %0, %c7_i32 : i32
    %58 = arith.index_cast %arg1 : i32 to index
    %59 = arith.index_cast %57 : i32 to index
    %60 = memref.load %arg2[%58, %59] : memref<2x8xi32, #tpu.memory_space<smem>>
    %c0_i32_14 = arith.constant 0 : i32
    %61 = tpu.memref_slice %arg3[%60, %c0_i32_14] : memref<64x128xf32, #tpu.memory_space<any>> -> memref<1x128xf32, #tpu.memory_space<any>>
    %62 = tpu.memref_squeeze %61 : memref<1x128xf32, #tpu.memory_space<any>> -> memref<128xf32, #tpu.memory_space<any>>
    %c0_i32_15 = arith.constant 0 : i32
    %63 = tpu.memref_slice %arg6[%c7_i32, %c0_i32_15] : memref<8x128xf32, #tpu.memory_space<vmem>> -> memref<1x128xf32, #tpu.memory_space<vmem>>
    %64 = tpu.memref_squeeze %63 : memref<1x128xf32, #tpu.memory_space<vmem>> -> memref<128xf32, #tpu.memory_space<vmem>>
    tpu.enqueue_dma source(%62 : memref<128xf32, #tpu.memory_space<any>>) target(%64 : memref<128xf32, #tpu.memory_space<vmem>>) target_semaphore(%arg7 : memref<!tpu.dma_semaphore, #tpu.memory_space<semaphore_mem>>)
    %c8_i32_16 = arith.constant 8 : i32
    tpu.wait_dma2 semaphore(%arg7 : memref<!tpu.dma_semaphore, #tpu.memory_space<semaphore_mem>>) src(%arg6 : memref<8x128xf32, #tpu.memory_space<vmem>>) dst(%arg6 : memref<8x128xf32, #tpu.memory_space<vmem>>)
    %c0 = arith.constant 0 : index
    %c0_17 = arith.constant 0 : index
    %65 = vector.load %arg6[%c0, %c0_17] : memref<8x128xf32, #tpu.memory_space<vmem>>, vector<8x128xf32>
    %cst = arith.constant 11.3137083 : f32
    %66 = vector.broadcast %cst : f32 to vector<8x128xf32>
    %67 = arith.mulf %65, %66 : vector<8x128xf32>
    %c0_18 = arith.constant 0 : index
    %c0_19 = arith.constant 0 : index
    %68 = vector.load %arg4[%c0_18, %c0_19] : memref<8x128xf32, #tpu.memory_space<vmem>>, vector<8x128xf32>
    %69 = arith.addf %67, %68 : vector<8x128xf32>
    %c0_20 = arith.constant 0 : index
    %c0_21 = arith.constant 0 : index
    %c0_22 = arith.constant 0 : index
    %70 = vector.load %arg5[%c0_20, %c0_21, %c0_22] : memref<1x8x128xf32, #tpu.memory_space<vmem>>, vector<1x8x128xf32>
    %71 = vector.shape_cast %70 : vector<1x8x128xf32> to vector<8x128xf32>
    %72 = vector.shape_cast %69 : vector<8x128xf32> to vector<1x8x128xf32>
    tpu.vector_store %arg5[%c0_20, %c0_21, %c0_22], %72 {strides = array<i32>} : memref<1x8x128xf32, #tpu.memory_space<vmem>>, vector<1x8x128xf32>,
    return
  }
  func.func @transform_1(%arg0: i32, %arg1: i32, %arg2: memref<2x8xi32, #tpu.memory_space<smem>>) -> (i32, i32) {
    %c0_i32 = arith.constant 0 : i32
    %c0_i32_0 = arith.constant 0 : i32
    return %arg0, %c0_i32 : i32, i32
  }
  func.func @transform_2(%arg0: i32, %arg1: i32, %arg2: memref<2x8xi32, #tpu.memory_space<smem>>) -> (i32, i32, i32) {
    %c0_i32 = arith.constant 0 : i32
    %c0_i32_0 = arith.constant 0 : i32
    return %arg1, %arg0, %c0_i32 : i32, i32, i32
  }
}

</mosaic_0001>

<bundles_post_ra>
// kernel: tpu_custom_call.1
= control target key start
LH: loop header
LB: loop body
LE: loop exit
PB: predicated region body
PF: predicated region fallthrough
CT: control target
= control target key end

     0   :  { %s1176_s0 = inlined_call_operand.hbm [shape: s32[2,8], index: 0, kind: input, shape index: {}]   ;;  %s1177_s1 = inlined_call_operand.hbm [shape: f32[64,128], index: 1, kind: input, shape index: {}]   ;;  %s1178_s2 = inlined_call_operand.hbm [shape: f32[8,128], index: 2, kind: input, shape index: {}]   ;;  %s1179_s3 = inlined_call_operand.hbm [shape: f32[2,8,128], index: 3, kind: output, shape index: {}]  }
   0x1   :  { %1186 = sst [smem:[#allocation33_spill]] %s1178_s2  ;;  %s536_s14 = scalar_lea.hbm %s1176_s0, 32 }
   0x2   :  { %p537_p0 = scmp.ne.s32.totalorder %s1176_s0, %s536_s14  ;;  %p540_p1 = scmp.lt.u32.totalorder %s536_s14, %s1176_s0 }
   0x4   :  { %p542_p2 = pnand %p540_p1, %p537_p0 }
   0x6   :  { %545 = shalt.err (!%p542_p2)  }
   0x7   :  { %s854_s19 = smov [#allocation5]  }
   0x8   :  { %9 = dma.hbm_to_smem %s1176_s0, 32, %s854_s19, [#allocation4] }
   0x9   :  { %818 = dma.done.wait [#allocation4], 32 }
   0xa   :  { %819 = vsyncadd [#allocation4], 4294967264 }
   0xb   :  { %11 = sfence }
   0xc   :  { %12 = vsyncpa [#allocation7], 0 }
   0xd   :  { %13 = vsyncpa [#allocation8], 0 }
   0xe   :  { %15 = vsyncpa [#allocation8 + $0x1], 0  ;;  %s897_s22 = smov 0   ;;  %s899_s23 = smov 0  }
   0xf   :  { %s901_s24 = smov 0   ;;  %s903_s25 = smov 0  }
  0x10   :  { %s905_s26 = smov 0   ;;  %s907_s27 = smov 0  }
  0x11 LB: > { %s433_s0 = sadd.s32 4294967295, %s852_s27   ;;  %s434_s28 = sadd.s32 4294967294, %s852_s27   ;;  %s852_s27 = sphi %s907_s27, %s21_s27   ;;  %s848_s26 = sphi %s905_s26, %s1204_s26   ;;  %s844_s25 = sphi %s903_s25, %s1203_s25   ;;  %s840_s24 = sphi %s901_s24, %s1202_s24   ;;  %s836_s23 = sphi %s899_s23, %s1201_s23   ;;  %s832_s22 = sphi %s897_s22, %s1200_s22  }
  0x12   : > { %s30_s29 = sadd.s32 1, %s848_s26  ;;  %s68_s30 = sadd.s32 1, %s840_s24 }
  0x13   : > { %p31_p3 = scmp.ge.s32.totalorder %s30_s29, 2  ;;  %p78_p4 = scmp.ne.s32.totalorder %s840_s24, %s836_s23 }
  0x14   : > { %p79_p5 = scmp.eq.s32.totalorder %s433_s0, 1  ;;  %p84_p6 = scmp.ne.s32.totalorder %s836_s23, %s832_s22 }
  0x15   : > { %s1206_s29 = smov (%p31_p3, %s30_s29), 0  ;;  %p85_p8 = scmp.eq.s32.totalorder %s434_s28, 1 }
  0x16   : > { %1187 = sst [smem:[#allocation32_spill]] %s1206_s29  ;;  %p937_p7 = por %p79_p5, %p78_p4 }
  0x17   : > { %s63_s5 = ssub.s32 %s848_s26, %s1206_s29  ;;  %p435_p9 = scmp.ge.s32.totalorder %s852_s27, 1 }
  0x18   : > { %s1188_s4 = scalar_select %p937_p7, 1, 0 }
  0x19   : > { %p66_p10 = scmp.eq.s32.totalorder %s63_s5, 0  ;;  %p944_p11 = por %p85_p8, %p84_p6 }
  0x1a   : > { %p92_p12 = scmp.lt.s32.totalorder %s852_s27, 3  ;;  %p956_p0 = scmp.eq.s32.totalorder %s433_s0, 0 }
  0x1b   : > { %s1189_s6 = scalar_select %p944_p11, 1, 0 }
  0x1c   : > { %s950_s7 = scalar_select %p66_p10, %s840_s24, %s68_s30  }
  0x1d   : > { %p952_p13 = pnand %p435_p9, %p92_p12  ;;  %s855_s10 = smov [#allocation6]  }
  0x1e   : > { %s1191_s9 = scalar_select %p956_p0, 1, 0 }
  0x1f   : > { %s1190_s8 = scalar_select %p952_p13, 1, 0 }
  0x20   : > { %p467_p1 = pneg %p952_p13  ;;  %s107_s11 = sshll.u32 %s855_s10, 4  ;;  %s108_s11 = int_to_ptr.vmem [resolvable:$true] %s107_s11 }
  0x21   : > { %s1193_s2 = sld [smem:[#allocation33_spill]] }
  0x22   : > { %p964_p2 = pnand %p956_p0, %p467_p1 }
  0x24   : > { %p548_p4 = pneg %p964_p2 }
  0x27   : > { %s546_s15 = scalar_lea.hbm %s1193_s2, 128 }
  0x28   : > { %p547_p3 = scmp.ne.s32.totalorder %s1193_s2, %s546_s15  ;;  %p553_p8 = scmp.lt.u32.totalorder %s546_s15, %s1193_s2 }
  0x2a   : > { %p549_p5 = pnand %p548_p4, %p547_p3 }
  0x2c   : > { %p550_p6 = pneg %p549_p5 }
  0x2e   : > { %p555_p9 = pnand %p553_p8, %p550_p6 }
  0x30   : > { %558 = shalt.err (!%p555_p9)
}
  0x31   : > { %s559_s20 = scalar_lea.vmem %s108_s11, 128  ;;  %p567_p11 = scmp.lt.s32.totalorder %s108_s11, %s108_s11 }
  0x32   : > { %p560_p10 = scmp.ne.s32.totalorder %s108_s11, %s559_s20  ;;  %p568_p7 = scmp.lt.s32.totalorder %s559_s20, %s559_s20 }
  0x34   : > { %p562_p12 = pnand %p560_p10, %p548_p4  ;;  %p569_p0 = por %p568_p7, %p567_p11 }
  0x36   : > { %p563_p1 = pneg %p562_p12 }
  0x38   : > { %p570_p13 = pnand %p569_p0, %p563_p1 }
  0x3a   : > { %573 = shalt.err (!%p570_p13)
}
  0x3b   : > { %470 = dma.hbm_to_vmem [thread:$0]  (!%p964_p2), %s1193_s2, 128, %s108_s11, [#allocation7]  }
  0x3c   : > { %p1194_p3 = scmp.ne.s32.totalorder %s1190_s8, 0 }
  0x3d   : > { %p1195_p5 = scmp.ne.s32.totalorder (!%p1194_p3), %s1191_s9, 0 }
  0x3e   : > { %120 = sbr.rel (%p1194_p3) target bundleno = 278 (0x116), region = 24 }
  0x45   : > { %821 = dma.done.wait (%p1195_p5), [#allocation7], 128  }
  0x46   : > { %823 = vsyncadd (%p1195_p5), [#allocation7], 4294967168  ;;  %s1184_s28 = sand.u32 1, %s836_s23   ;;  %s992_s30 = sshll.u32 %s844_s25, 7 }
  0x47   : > { %s996_s5 = sshll.u32 %s1184_s28, 3  ;;  %s143_s8 = sld [smem:[#allocation5 + %s992_s30]] }
  0x48   : > { %s856_s10 = smov [#allocation2]   ;;  %s164_s12 = sadd.s32 1, %s992_s30 }
  0x49   : > { %s153_s11 = sshll.u32 %s856_s10, 4  ;;  %s1002_s9 = sld [smem:[#allocation5 + %s164_s12]]  ;;  %s1000_s11 = int_to_ptr.vmem [resolvable:$true] %s153_s11 }
  0x4a   : > { %s187_s13 = sadd.s32 2, %s992_s30  ;;  %s857_s14 = smov [#allocation2 + $0x1]  }
  0x4b   : > { %s176_s15 = sshll.u32 %s857_s14, 4  ;;  %s1005_s16 = sld [smem:[#allocation5 + %s187_s13]]  ;;  %s1007_s15 = int_to_ptr.vmem [resolvable:$true] %s176_s15 }
  0x4c   : > { %s1015_s10 = scalar_lea.hbm %s1177_s1, 1024 }
  0x4d   : > { %s441_s25 = sshll.u32 %s143_s8, 4 }
  0x4e   : > { %s145_s19 = scalar_lea.hbm %s1177_s1, %s441_s25 }
  0x4f   : > { %s574_s20 = scalar_lea.hbm %s145_s19, 16  ;;  %p577_p11 = scmp.lt.u32.totalorder %s145_s19, %s1177_s1 }
  0x50   : > { %p575_p7 = scmp.ne.s32.totalorder %s145_s19, %s574_s20  ;;  %p578_p13 = scmp.lt.u32.totalorder %s1015_s10, %s574_s20 }
  0x51   : > { %p580_p2 = scmp.lt.u32.totalorder %s574_s20, %s145_s19 }
  0x52   : > { %p579_p0 = por %p578_p13, %p577_p11 }
  0x54   : > { %p581_p4 = por %p580_p2, %p579_p0 }
  0x56   : > { %p582_p6 = pnand %p581_p4, %p575_p7 }
  0x58   : > { %585 = shalt.err (!%p582_p6)  }
  0x59   : > { %s586_s8 = scalar_lea.vmem %s1000_s11, 16  ;;  %s1024_s13 = scalar_lea.vmem %s1000_s11, 128 }
  0x5a   : > { %p587_p8 = scmp.ne.s32.totalorder %s1000_s11, %s586_s8  ;;  %p591_p9 = scmp.lt.s32.totalorder %s1000_s11, %s1000_s11 }
  0x5b   : > { %p592_p10 = scmp.lt.s32.totalorder %s1024_s13, %s586_s8 }
  0x5d   : > { %p593_p12 = por %p592_p10, %p591_p9 }
  0x5f   : > { %p594_p1 = pnand %p593_p12, %p587_p8 }
  0x61   : > { %597 = shalt.err (!%p594_p1)  }
  0x62   : > { %156 = dma.hbm_to_vmem [thread:$0]  %s145_s19, 16, %s1000_s11, [#allocation3] }
  0x63   : > { %s443_s28 = sshll.u32 %s1002_s9, 4  ;;  %s858_s14 = smov [#allocation2 + $0x2]  }
  0x64   : > { %s199_s25 = sshll.u32 %s858_s14, 4  ;;  %s167_s20 = scalar_lea.hbm %s1177_s1, %s443_s28  ;;  %s1034_s25 = int_to_ptr.vmem [resolvable:$true] %s199_s25 }
  0x65   : > { %s598_s21 = scalar_lea.hbm %s167_s20, 16  ;;  %p601_p5 = scmp.lt.u32.totalorder %s167_s20, %s1177_s1 }
  0x66   : > { %p599_p3 = scmp.ne.s32.totalorder %s167_s20, %s598_s21  ;;  %p602_p7 = scmp.lt.u32.totalorder %s1015_s10, %s598_s21 }
  0x67   : > { %p604_p13 = scmp.lt.u32.totalorder %s598_s21, %s167_s20 }
  0x68   : > { %p603_p11 = por %p602_p7, %p601_p5 }
  0x6a   : > { %p605_p0 = por %p604_p13, %p603_p11 }
  0x6c   : > { %p606_p2 = pnand %p605_p0, %p599_p3 }
  0x6e   : > { %609 = shalt.err (!%p606_p2)  }
  0x6f   : > { %s610_s9 = scalar_lea.vmem %s1007_s15, 16  ;;  %p615_p6 = scmp.lt.s32.totalorder %s1007_s15, %s1000_s11 }
  0x70   : > { %p611_p4 = scmp.ne.s32.totalorder %s1007_s15, %s610_s9  ;;  %p616_p8 = scmp.lt.s32.totalorder %s1024_s13, %s610_s9 }
  0x72   : > { %p617_p9 = por %p616_p8, %p615_p6 }
  0x74   : > { %p618_p10 = pnand %p617_p9, %p611_p4 }
  0x76   : > { %621 = shalt.err (!%p618_p10)  }
  0x77   : > { %179 = dma.hbm_to_vmem [thread:$0]  %s167_s20, 16, %s1007_s15, [#allocation3] }
  0x78   : > { %s445_s19 = sshll.u32 %s1005_s16, 4  ;;  %s210_s8 = sadd.s32 3, %s992_s30 }
  0x79   : > { %s190_s17 = scalar_lea.hbm %s1177_s1, %s445_s19  ;;  %s1051_s18 = sld [smem:[#allocation5 + %s210_s8]] }
  0x7a   : > { %s622_s21 = scalar_lea.hbm %s190_s17, 16  ;;  %p625_p1 = scmp.lt.u32.totalorder %s190_s17, %s1177_s1 }
  0x7b   : > { %p623_p12 = scmp.ne.s32.totalorder %s190_s17, %s622_s21  ;;  %p626_p3 = scmp.lt.u32.totalorder %s1015_s10, %s622_s21 }
  0x7c   : > { %p628_p7 = scmp.lt.u32.totalorder %s622_s21, %s190_s17 }
  0x7d   : > { %p627_p5 = por %p626_p3, %p625_p1 }
  0x7f   : > { %p629_p11 = por %p628_p7, %p627_p5 }
  0x81   : > { %p630_p13 = pnand %p629_p11, %p623_p12 }
  0x83   : > { %633 = shalt.err (!%p630_p13)  }
  0x84   : > { %s634_s15 = scalar_lea.vmem %s1034_s25, 16  ;;  %p639_p2 = scmp.lt.s32.totalorder %s1034_s25, %s1000_s11 }
  0x85   : > { %p635_p0 = scmp.ne.s32.totalorder %s1034_s25, %s634_s15  ;;  %p640_p4 = scmp.lt.s32.totalorder %s1024_s13, %s634_s15 }
  0x87   : > { %p641_p6 = por %p640_p4, %p639_p2 }
  0x89   : > { %p642_p8 = pnand %p641_p6, %p635_p0 }
  0x8b   : > { %645 = shalt.err (!%p642_p8)  }
  0x8c   : > { %202 = dma.hbm_to_vmem [thread:$0]  %s190_s17, 16, %s1034_s25, [#allocation3] }
  0x8d   : > { %s233_s16 = sadd.s32 4, %s992_s30  ;;  %s859_s20 = smov [#allocation2 + $0x3]  }
  0x8e   : > { %s222_s9 = sshll.u32 %s859_s20, 4  ;;  %s234_s19 = sld [smem:[#allocation5 + %s233_s16]]  ;;  %s223_s9 = int_to_ptr.vmem [resolvable:$true] %s222_s9 }
  0x8f   : > { %s860_s8 = smov [#allocation2 + $0x4]   ;;  %s256_s14 = sadd.s32 5, %s992_s30 }
  0x90   : > { %s245_s28 = sshll.u32 %s860_s8, 4  ;;  %s447_s21 = sshll.u32 %s1051_s18, 4  ;;  %s1066_s28 = int_to_ptr.vmem [resolvable:$true] %s245_s28 }
  0x91   : > { %s213_s15 = scalar_lea.hbm %s1177_s1, %s447_s21  ;;  %s1071_s2 = sld [smem:[#allocation5 + %s256_s14]] }
  0x92   : > { %s646_s29 = scalar_lea.hbm %s213_s15, 16  ;;  %p649_p10 = scmp.lt.u32.totalorder %s213_s15, %s1177_s1 }
  0x93   : > { %p647_p9 = scmp.ne.s32.totalorder %s213_s15, %s646_s29  ;;  %p650_p12 = scmp.lt.u32.totalorder %s1015_s10, %s646_s29 }
  0x94   : > { %p652_p3 = scmp.lt.u32.totalorder %s646_s29, %s213_s15 }
  0x95   : > { %p651_p1 = por %p650_p12, %p649_p10 }
  0x97   : > { %p653_p5 = por %p652_p3, %p651_p1 }
  0x99   : > { %p654_p7 = pnand %p653_p5, %p647_p9 }
  0x9b   : > { %657 = shalt.err (!%p654_p7)  }
  0x9c   : > { %s658_s18 = scalar_lea.vmem %s223_s9, 16  ;;  %p663_p13 = scmp.lt.s32.totalorder %s223_s9, %s1000_s11 }
  0x9d   : > { %p659_p11 = scmp.ne.s32.totalorder %s223_s9, %s658_s18  ;;  %p664_p0 = scmp.lt.s32.totalorder %s1024_s13, %s658_s18 }
  0x9f   : > { %p665_p2 = por %p664_p0, %p663_p13 }
  0xa1   : > { %p666_p4 = pnand %p665_p2, %p659_p11 }
  0xa3   : > { %669 = shalt.err (!%p666_p4)  }
  0xa4   : > { %225 = dma.hbm_to_vmem [thread:$0]  %s213_s15, 16, %s223_s9, [#allocation3] }
  0xa5   : > { %s449_s16 = sshll.u32 %s234_s19, 4  ;;  %s861_s29 = smov [#allocation2 + $0x5]  }
  0xa6   : > { %s236_s14 = scalar_lea.hbm %s1177_s1, %s449_s16  ;;  %s268_s21 = sshll.u32 %s861_s29, 4  ;;  %s269_s21 = int_to_ptr.vmem [resolvable:$true] %s268_s21 }
  0xa7   : > { %s670_s0 = scalar_lea.hbm %s236_s14, 16  ;;  %p673_p8 = scmp.lt.u32.totalorder %s236_s14, %s1177_s1 }
  0xa8   : > { %p671_p6 = scmp.ne.s32.totalorder %s236_s14, %s670_s0  ;;  %p674_p9 = scmp.lt.u32.totalorder %s1015_s10, %s670_s0 }
  0xa9   : > { %p676_p12 = scmp.lt.u32.totalorder %s670_s0, %s236_s14 }
  0xaa   : > { %p675_p10 = por %p674_p9, %p673_p8 }
  0xac   : > { %p677_p1 = por %p676_p12, %p675_p10 }
  0xae   : > { %p678_p3 = pnand %p677_p1, %p671_p6 }
  0xb0   : > { %681 = shalt.err (!%p678_p3)  }
  0xb1   : > { %s682_s9 = scalar_lea.vmem %s1066_s28, 16  ;;  %p687_p7 = scmp.lt.s32.totalorder %s1066_s28, %s1000_s11 }
  0xb2   : > { %p683_p5 = scmp.ne.s32.totalorder %s1066_s28, %s682_s9  ;;  %p688_p11 = scmp.lt.s32.totalorder %s1024_s13, %s682_s9 }
  0xb4   : > { %p689_p13 = por %p688_p11, %p687_p7 }
  0xb6   : > { %p690_p0 = pnand %p689_p13, %p683_p5 }
  0xb8   : > { %693 = shalt.err (!%p690_p0)  }
  0xb9   : > { %248 = dma.hbm_to_vmem [thread:$0]  %s236_s14, 16, %s1066_s28, [#allocation3] }
  0xba   : > { %s279_s19 = sadd.s32 6, %s992_s30  ;;  %s451_s15 = sshll.u32 %s1071_s2, 4 }
  0xbb   : > { %s280_s17 = sld [smem:[#allocation5 + %s279_s19]]  ;;  %s259_s20 = scalar_lea.hbm %s1177_s1, %s451_s15 }
  0xbc   : > { %s694_s8 = scalar_lea.hbm %s259_s20, 16  ;;  %p697_p4 = scmp.lt.u32.totalorder %s259_s20, %s1177_s1 }
  0xbd   : > { %p695_p2 = scmp.ne.s32.totalorder %s259_s20, %s694_s8  ;;  %p698_p6 = scmp.lt.u32.totalorder %s1015_s10, %s694_s8 }
  0xbe   : > { %p700_p9 = scmp.lt.u32.totalorder %s694_s8, %s259_s20 }
  0xbf   : > { %p699_p8 = por %p698_p6, %p697_p4 }
  0xc1   : > { %p701_p10 = por %p700_p9, %p699_p8 }
  0xc3   : > { %p702_p12 = pnand %p701_p10, %p695_p2 }
  0xc5   : > { %705 = shalt.err (!%p702_p12)  }
  0xc6   : > { %s706_s28 = scalar_lea.vmem %s269_s21, 16  ;;  %p711_p3 = scmp.lt.s32.totalorder %s269_s21, %s1000_s11 }
  0xc7   : > { %p707_p1 = scmp.ne.s32.totalorder %s269_s21, %s706_s28  ;;  %p712_p5 = scmp.lt.s32.totalorder %s1024_s13, %s706_s28 }
  0xc9   : > { %p713_p7 = por %p712_p5, %p711_p3 }
  0xcb   : > { %p714_p11 = pnand %p713_p7, %p707_p1 }
  0xcd   : > { %717 = shalt.err (!%p714_p11)  }
  0xce   : > { %271 = dma.hbm_to_vmem [thread:$0]  %s259_s20, 16, %s269_s21, [#allocation3] }
  0xcf   : > { %s862_s2 = smov [#allocation2 + $0x6]   ;;  %s302_s12 = sadd.s32 7, %s992_s30 }
  0xd0   : > { %s291_s14 = sshll.u32 %s862_s2, 4  ;;  %s303_s25 = sld [smem:[#allocation5 + %s302_s12]]  ;;  %s292_s14 = int_to_ptr.vmem [resolvable:$true] %s291_s14 }
  0xd1   : > { %s453_s9 = sshll.u32 %s280_s17, 4  ;;  %s863_s19 = smov [#allocation2 + $0x7]  }
  0xd2   : > { %s314_s15 = sshll.u32 %s863_s19, 4  ;;  %s282_s8 = scalar_lea.hbm %s1177_s1, %s453_s9  ;;  %s315_s15 = int_to_ptr.vmem [resolvable:$true] %s314_s15 }
  0xd3   : > { %s718_s29 = scalar_lea.hbm %s282_s8, 16  ;;  %p721_p0 = scmp.lt.u32.totalorder %s282_s8, %s1177_s1 }
  0xd4   : > { %p719_p13 = scmp.ne.s32.totalorder %s282_s8, %s718_s29  ;;  %p722_p2 = scmp.lt.u32.totalorder %s1015_s10, %s718_s29 }
  0xd5   : > { %p724_p6 = scmp.lt.u32.totalorder %s718_s29, %s282_s8 }
  0xd6   : > { %p723_p4 = por %p722_p2, %p721_p0 }
  0xd8   : > { %p725_p8 = por %p724_p6, %p723_p4 }
  0xda   : > { %p726_p9 = pnand %p725_p8, %p719_p13 }
  0xdc   : > { %729 = shalt.err (!%p726_p9)  }
  0xdd   : > { %s730_s21 = scalar_lea.vmem %s292_s14, 16  ;;  %p735_p12 = scmp.lt.s32.totalorder %s292_s14, %s1000_s11 }
  0xde   : > { %p731_p10 = scmp.ne.s32.totalorder %s292_s14, %s730_s21  ;;  %p736_p1 = scmp.lt.s32.totalorder %s1024_s13, %s730_s21 }
  0xe0   : > { %p737_p3 = por %p736_p1, %p735_p12 }
  0xe2   : > { %p738_p5 = pnand %p737_p3, %p731_p10 }
  0xe4   : > { %741 = shalt.err (!%p738_p5)  }
  0xe5   : > { %294 = dma.hbm_to_vmem [thread:$0]  %s282_s8, 16, %s292_s14, [#allocation3] }
  0xe6   : > { %s455_s17 = sshll.u32 %s303_s25, 4 }
  0xe7   : > { %s305_s12 = scalar_lea.hbm %s1177_s1, %s455_s17 }
  0xe8   : > { %s742_s9 = scalar_lea.hbm %s305_s12, 16  ;;  %p745_p11 = scmp.lt.u32.totalorder %s305_s12, %s1177_s1 }
  0xe9   : > { %p743_p7 = scmp.ne.s32.totalorder %s305_s12, %s742_s9  ;;  %p746_p13 = scmp.lt.u32.totalorder %s1015_s10, %s742_s9 }
  0xea   : > { %p748_p2 = scmp.lt.u32.totalorder %s742_s9, %s305_s12 }
  0xeb   : > { %p747_p0 = por %p746_p13, %p745_p11 }
  0xed   : > { %p749_p4 = por %p748_p2, %p747_p0 }
  0xef   : > { %p750_p6 = pnand %p749_p4, %p743_p7 }
  0xf1   : > { %753 = shalt.err (!%p750_p6)  }
  0xf2   : > { %s754_s14 = scalar_lea.vmem %s315_s15, 16  ;;  %p759_p9 = scmp.lt.s32.totalorder %s315_s15, %s1000_s11 }
  0xf3   : > { %p755_p8 = scmp.ne.s32.totalorder %s315_s15, %s754_s14  ;;  %p760_p10 = scmp.lt.s32.totalorder %s1024_s13, %s754_s14 }
  0xf5   : > { %p761_p12 = por %p760_p10, %p759_p9 }
  0xf7   : > { %p762_p1 = pnand %p761_p12, %p755_p8 }
  0xf9   : > { %765 = shalt.err (!%p762_p1)  }
  0xfa   : > { %317 = dma.hbm_to_vmem [thread:$0]  %s305_s12, 16, %s315_s15, [#allocation3] }
  0xfb   : > { %s134_s25 = scalar_lea.vmem [#allocation9], %s996_s5 }
  0xfc   : > { %824 = dma.done.wait [#allocation3], 128 }
  0xfd   : > { %825 = vsyncadd [#allocation3], 4294967168  ;;  %v321_v0 = vld [vmem:[#allocation2] sm:$0xff]  ;;  %v323_v1 = vld [vmem:[#allocation6] sm:$0xff]  ;;  %s341_s10 = sshll.u32 %s134_s25, 4  ;;  %s1127_s11 = scalar_lea.hbm %s1179_s3, %s992_s30  ;;  %s1129_s10 = int_to_ptr.vmem [resolvable:$true] %s341_s10 }
  0xfe   : > { %v322_v2 = vmul.f32 11.313708, %v321_v0  ;;  %s1196_s5 = sand.u32 1, %s836_s23   ;;  %s766_s15 = scalar_lea.vmem %s1129_s10, 128 }
  0xff   : > { %s327_s13 = scalar_lea.sflag [#allocation8], %s1196_s5  ;;  %p767_p3 = scmp.ne.s32.totalorder %s1129_s10, %s766_s15 }
 0x100   : > { %v324_v3 = vadd.f32 %v323_v1, %v322_v2  ;;  %p1197_p5 = scmp.ne.s32.totalorder %s1188_s4, 0  ;;  %s864_s29 = smov [#allocation9]  }
 0x101   : > { %s770_s0 = sshll.u32 %s864_s29, 4  ;;  %s771_s0 = int_to_ptr.vmem [resolvable:$false] %s770_s0 }
 0x102   : > { %325 = vst [vmem:[%s134_s25] sm:$0xff] %v324_v3  ;;  %p768_p7 = pnand %p767_p3, %p1197_p5  ;;  %s772_s28 = scalar_lea.vmem %s771_s0, 256 }
 0x103   : > { %p773_p13 = scmp.lt.s32.totalorder %s1129_s10, %s771_s0  ;;  %p774_p0 = scmp.lt.s32.totalorder %s772_s28, %s766_s15 }
 0x104   : > { %p769_p11 = pneg %p768_p7 }
 0x105   : > { %p775_p2 = por %p774_p0, %p773_p13 }
 0x107   : > { %p776_p4 = pnand %p775_p2, %p769_p11 }
 0x109   : > { %779 = shalt.err (!%p776_p4)
}
 0x10a   : > { %s780_s30 = scalar_lea.hbm %s1127_s11, 128  ;;  %s784_s20 = scalar_lea.hbm %s1179_s3, 256 }
 0x10b   : > { %p781_p6 = scmp.ne.s32.totalorder %s1127_s11, %s780_s30  ;;  %p785_p10 = scmp.lt.u32.totalorder %s1127_s11, %s1179_s3 }
 0x10c   : > { %p786_p12 = scmp.lt.u32.totalorder %s784_s20, %s780_s30  ;;  %p788_p3 = scmp.lt.u32.totalorder %s780_s30, %s1127_s11 }
 0x10d   : > { %p782_p8 = pnand %p781_p6, %p1197_p5 }
 0x10e   : > { %p787_p1 = por %p786_p12, %p785_p10 }
 0x10f   : > { %p783_p9 = pneg %p782_p8 }
 0x110   : > { %p789_p7 = por %p788_p3, %p787_p1 }
 0x112   : > { %p790_p11 = pnand %p789_p7, %p783_p9 }
 0x114   : > { %793 = shalt.err (!%p790_p11)
}
 0x115   : > { %465 = dma.vmem_to_hbm [thread:$0]  (%p1197_p5), %s1129_s10, 128, %s1127_s11, %s327_s13  }
 0x116 PF: > { %p477_p13 = scmp.ge.s32.totalorder %s852_s27, 2  ;;  %s353_s9 = sand.u32 1, %s832_s22  }
 0x117   : > { %p1198_p0 = scmp.ne.s32.totalorder %s1189_s6, 0  ;;  %s354_s19 = scalar_lea.sflag [#allocation8], %s353_s9 }
 0x119   : > { %p472_p2 = pnand %p477_p13, %p1198_p0 }
 0x11b   : > { %827 = dma.done.wait (!%p472_p2), %s354_s19, 128  }
 0x11c   : > { %829 = vsyncadd (!%p472_p2), %s354_s19, 4294967168  ;;  %s21_s27 = sadd.s32 1, %s852_s27   ;;  %s1199_s4 = sld [smem:[#allocation32_spill]] }
 0x11d   : > { %p18_p4 = scmp.ge.s32.totalorder %s21_s27, 4   ;;  %s1200_s22 = smov %s836_s23 }
 0x11e   : > { %s1201_s23 = smov %s840_s24  ;;  %s1202_s24 = smov %s950_s7 }
 0x11f   : > { %s1203_s25 = smov %s848_s26  ;;  %20 = sbr.rel (!%p18_p4) target bundleno = 17 (0x11), region = 109 }
 0x122   : > { %s1204_s26 = smov %s1199_s4 }
 0x126   :  { %359 = vsyncpa [#allocation7], 1 }
 0x127   :  { %361 = vsyncpa [#allocation7 + $0x1], 1 }
 0x128   :  { %362 = vsyncpa [#allocation8], 1 }
 0x129   :  { %364 = vsyncpa [#allocation8 + $0x1], 1 }
 0x12a   :  { %365 = vsyncmov [#allocation3] }
 0x12d   :  { %s366_s6 = vpop.sfrf %365 }
 0x12e   :  { %p460_p5 = scmp.ne.s32.totalorder %s366_s6, 0 }
 0x130   :  { %370 = shalt.err (%p460_p5)  }

</bundles_post_ra>
